<compile_context>
chip_gen: v7x
topology: tpu7x:2x2x1
jax: 0.10.0
libtpu: 0.0.40
codegen_flags: <defaults>
</compile_context>

<pallas_src>
import jax
import jax.numpy as jnp
from jax.experimental import pallas as pl
from jax.experimental.pallas import tpu as pltpu

LANE = 128


def _leaky_relu(x, slope=0.2):
    # one vmul + one vmax (cheaper than compare + select)
    return jnp.maximum(x, slope * x)


def _round_up(n, m):
    return ((n + m - 1) // m) * m


def _pad_to(a, axis, target):
    pad = target - a.shape[axis]
    if pad <= 0:
        return a
    widths = [(0, 0)] * a.ndim
    widths[axis] = (0, pad)
    return jnp.pad(a, widths)


def _vmem_capacity_bytes():
    try:
        info = pltpu.get_tpu_info()
        cap = getattr(info, "vmem_capacity_bytes", None)
        if cap:
            return int(cap)
    except Exception:
        pass
    return 64 << 20  # conservative default: v7x per-TensorCore VMEM


def _vmem_budget_bytes(resident_bytes):
    cap = _vmem_capacity_bytes()
    want = max(32 << 20, int(resident_bytes) + (16 << 20))  # generous headroom
    return int(min(want, int(cap * 0.75)))


# --------------------------------------------------------------------------
# Kernel: batch on the lane axis, weights VMEM-resident.
# --------------------------------------------------------------------------
def _mlp_kernel(x_ref,            # (d_in_p, TB)   bf16, batch on lanes
                w1_ref, b1_ref,   # (d1_p, d_in_p) bf16, (d1_p, 1) f32
                w2_ref, b2_ref,   # (d2_p, d1_p)   bf16, (d2_p, 1) f32
                w3_ref, b3_ref,   # (d3_p, d2_p)   bf16, (d3_p, 1) f32
                w4_ref, b4_ref,   # (d3_p, 1) f32,       (1, 1)    f32
                o_ref):           # (8, TB) f32 (score replicated over sublanes)
    cdt = w1_ref.dtype  # MXU input dtype (bf16); accumulation is f32

    # Layer 1: Linear + LeakyReLU(0.2)
    h = jnp.dot(w1_ref[...], x_ref[...], preferred_element_type=jnp.float32)
    h = _leaky_relu(h + b1_ref[...])

    # Layer 2: Linear + LeakyReLU(0.2)
    h = jnp.dot(w2_ref[...], h.astype(cdt), preferred_element_type=jnp.float32)
    h = _leaky_relu(h + b2_ref[...])

    # Layer 3: Linear + LeakyReLU(0.2)
    h = jnp.dot(w3_ref[...], h.astype(cdt), preferred_element_type=jnp.float32)
    h = _leaky_relu(h + b3_ref[...])

    # Layer 4 (score head, out_features=1): f32 VPU multiply + sublane reduce.
    # Batch stays on the lane axis -> lane-dense, unmasked (8, TB) store.
    s = jnp.sum(h * w4_ref[...], axis=0, keepdims=True) + b4_ref[...]   # (1, TB)
    o_ref[...] = jnp.broadcast_to(s, o_ref.shape).astype(o_ref.dtype)


# --------------------------------------------------------------------------
# One-time parameter preparation (hoisted out of the per-call path).
# --------------------------------------------------------------------------
def prepare_params(params, *, param_dtype=jnp.bfloat16):
    """Cast / transpose / lane-pad the weights once.

    Accepts weights shaped (in, out) and biases shaped (out,) or (1, out).
    Zero padding is exact (0-weights, 0-bias, leaky_relu(0)=0).
    """
    (w1, b1), (w2, b2), (w3, b3), (w4, b4) = params

    def col(b):  # accept (d,) or (1, d) biases
        return jnp.asarray(b, jnp.float32).reshape(-1, 1)

    d_in, d1 = w1.shape
    d2 = w2.shape[1]
    d3 = w3.shape[1]
    d_in_p, d1_p, d2_p, d3_p = (_round_up(d, LANE) for d in (d_in, d1, d2, d3))

    def wt(w, rows_p, cols_p):
        # stored transposed (out, in): the kernel computes W^T-style matmuls
        # with the batch on the lane axis.
        w_t = jnp.asarray(w, jnp.float32).T.astype(param_dtype)
        return _pad_to(_pad_to(w_t, 0, rows_p), 1, cols_p)

    return dict(
        dims=(d_in, d1, d2, d3),
        dims_p=(d_in_p, d1_p, d2_p, d3_p),
        param_dtype=param_dtype,
        w1=wt(w1, d1_p, d_in_p), b1=_pad_to(col(b1), 0, d1_p),
        w2=wt(w2, d2_p, d1_p),   b2=_pad_to(col(b2), 0, d2_p),
        w3=wt(w3, d3_p, d2_p),   b3=_pad_to(col(b3), 0, d3_p),
        w4=_pad_to(jnp.asarray(w4, jnp.float32).reshape(-1, 1), 0, d3_p),
        b4=jnp.asarray(b4, jnp.float32).reshape(1, 1),
    )


# --------------------------------------------------------------------------
# Forward
# --------------------------------------------------------------------------
def component_discriminator_forward(components, prepared, *, batch_tile=2048):
    """components: (B, n_components, n_classes) float -> (B, 1) float32."""
    if isinstance(prepared, (list, tuple)):  # convenience: raw params accepted
        prepared = prepare_params(prepared)

    B = components.shape[0]
    d_in = prepared["dims"][0]
    d_in_p, d1_p, d2_p, d3_p = prepared["dims_p"]
    pdt = prepared["param_dtype"]

    # nn.Flatten + cast + lane-pad + transpose (batch onto the lane axis) —
    # the only per-call wrapper work.
    x = components.reshape(B, -1)
    assert x.shape[1] == d_in, (x.shape, d_in)

    batch_tile = _round_up(batch_tile, LANE)
    TB = min(batch_tile, _round_up(B, LANE))     # small B: one 128-lane tile
    B_p = _round_up(B, TB)
    xt = _pad_to(_pad_to(x.astype(pdt), 1, d_in_p), 0, B_p).T   # (d_in_p, B_p)

    grid = (B_p // TB,)

    w_and_b = [prepared[k] for k in ("w1", "b1", "w2", "b2", "w3", "b3", "w4", "b4")]

    # ---- VMEM budget from actual resident bytes ----
    def nbytes(a):
        return a.size * a.dtype.itemsize

    itemsize = jnp.dtype(pdt).itemsize
    weight_bytes = sum(nbytes(a) for a in w_and_b)
    io_tile_bytes = 2 * d_in_p * TB * itemsize + 2 * 8 * TB * 4   # double-buffered
    act_bytes = (d1_p + d2_p + d3_p) * TB * 4 + (d1_p + d2_p) * TB * itemsize
    vmem_bytes = _vmem_budget_bytes(2 * weight_bytes + io_tile_bytes + act_bytes)

    # ---- cost estimate so XLA schedules around this small custom call ----
    flops = 2 * B_p * (d_in_p * d1_p + d1_p * d2_p + d2_p * d3_p + d3_p)
    bytes_accessed = int(nbytes(xt) + 8 * B_p * 4 + weight_bytes)
    cost = pl.CostEstimate(flops=int(flops), transcendentals=0,
                           bytes_accessed=bytes_accessed)

    const = lambda i: (0, 0)
    out = pl.pallas_call(
        _mlp_kernel,
        out_shape=jax.ShapeDtypeStruct((8, B_p), jnp.float32),
        grid=grid,
        in_specs=[
            pl.BlockSpec((d_in_p, TB), lambda i: (0, i)),   # batch-tiled input
            pl.BlockSpec(prepared["w1"].shape, const),      # weights / biases
            pl.BlockSpec(prepared["b1"].shape, const),      # stay VMEM-resident
            pl.BlockSpec(prepared["w2"].shape, const),      # across the batch
            pl.BlockSpec(prepared["b2"].shape, const),      # grid
            pl.BlockSpec(prepared["w3"].shape, const),
            pl.BlockSpec(prepared["b3"].shape, const),
            pl.BlockSpec(prepared["w4"].shape, const),
            pl.BlockSpec(prepared["b4"].shape, const),
        ],
        out_specs=pl.BlockSpec((8, TB), lambda i: (0, i)),
        compiler_params=pltpu.CompilerParams(
            dimension_semantics=("parallel",),
            vmem_limit_bytes=vmem_bytes),
        cost_estimate=cost,
    )(xt, *w_and_b)

    # Row 0 of the 8-sublane-replicated, lane-dense score slab.
    return out[0, :B].reshape(B, 1)


# --------------------------------------------------------------------------
# Init + pure-JAX reference
# --------------------------------------------------------------------------
def init_params(key, n_components, n_classes, n_features):
    """Deterministic init matching the PyTorch module's shapes.

    Weights: kaiming_normal_ (fan_in, gain=sqrt(2)), stored (in, out).
    Biases: PyTorch nn.Linear default U(-1/sqrt(fan_in), 1/sqrt(fan_in)).
    """
    d_in = n_components * n_classes
    dims = [d_in,
            n_components * n_features * 4,
            n_components * n_features * 2,
            n_components * n_features,
            1]
    params = []
    for i in range(4):
        fan_in, fan_out = dims[i], dims[i + 1]
        key, kw, kb = jax.random.split(key, 3)
        std = (2.0 / fan_in) ** 0.5  # kaiming_normal_, a=0, mode='fan_in'
        w = jax.random.normal(kw, (fan_in, fan_out), dtype=jnp.float32) * std
        bound = 1.0 / (fan_in ** 0.5)
        b = jax.random.uniform(kb, (1, fan_out), dtype=jnp.float32,
                               minval=-bound, maxval=bound)
        params.append((w, b))
    return params


def reference_forward(components, params, *, param_dtype=jnp.bfloat16):
    """Plain-JAX reference mirroring the kernel's dtype path exactly."""
    B = components.shape[0]
    (w1, b1), (w2, b2), (w3, b3), (w4, b4) = params
    row = lambda b: jnp.asarray(b, jnp.float32).reshape(1, -1)
    h = components.reshape(B, -1).astype(param_dtype)
    h = jnp.dot(h, jnp.asarray(w1, param_dtype), preferred_element_type=jnp.float32)
    h = _leaky_relu(h + row(b1))
    h = jnp.dot(h.astype(param_dtype), jnp.asarray(w2, param_dtype),
                preferred_element_type=jnp.float32)
    h = _leaky_relu(h + row(b2))
    h = jnp.dot(h.astype(param_dtype), jnp.asarray(w3, param_dtype),
                preferred_element_type=jnp.float32)
    h = _leaky_relu(h + row(b3))
    s = jnp.sum(h * row(jnp.asarray(w4).reshape(-1)), axis=-1, keepdims=True)
    return s + jnp.asarray(b4, jnp.float32).reshape(1, 1)


if __name__ == "__main__":
    # Small shapes consistent with the module.
    n_components, n_classes, n_features = 4, 8, 16
    batch = 2

    key = jax.random.PRNGKey(0)
    key, kx = jax.random.split(key)
    components = jax.random.normal(
        kx, (batch, n_components, n_classes), dtype=jnp.float32)

    params = init_params(key, n_components, n_classes, n_features)
    prepared = prepare_params(params)   # hoisted: cast/transpose/pad once

    score = component_discriminator_forward(components, prepared)
    score = jax.block_until_ready(score)

    ref = reference_forward(components, params)
    assert score.shape == (batch, 1), score.shape
    assert jnp.allclose(score, ref, atol=5e-3, rtol=5e-3), (score, ref)

    print("KERNEL_OK")
</pallas_src>

<mosaic_0001>
module attributes {stable_mosaic.version = 11 : i64} {
  func.func @_mlp_kernel(%arg0: i32, %arg1: memref<128x128xbf16, #tpu.memory_space<vmem>>, %arg2: memref<256x128xbf16, #tpu.memory_space<vmem>>, %arg3: memref<256x1xf32, #tpu.memory_space<vmem>>, %arg4: memref<128x256xbf16, #tpu.memory_space<vmem>>, %arg5: memref<128x1xf32, #tpu.memory_space<vmem>>, %arg6: memref<128x128xbf16, #tpu.memory_space<vmem>>, %arg7: memref<128x1xf32, #tpu.memory_space<vmem>>, %arg8: memref<128x1xf32, #tpu.memory_space<vmem>>, %arg9: memref<1x1xf32, #tpu.memory_space<vmem>>, %arg10: memref<8x128xf32, #tpu.memory_space<vmem>>) attributes {dimension_semantics = [#tpu.dimension_semantics<parallel>], iteration_bounds = array<i64: 1>, scalar_prefetch = 0 : i64, scratch_operands = 0 : i64, tpu.core_type = #tpu.core_type<tc>, window_params = [{transform_indices = @transform_0, window_bounds = array<i64: 128, 128>}, {pipeline_mode = #tpu.pipeline_mode<synchronous>, transform_indices = @transform_1, window_bounds = array<i64: 256, 128>}, {pipeline_mode = #tpu.pipeline_mode<synchronous>, transform_indices = @transform_2, window_bounds = array<i64: 256, 1>}, {pipeline_mode = #tpu.pipeline_mode<synchronous>, transform_indices = @transform_3, window_bounds = array<i64: 128, 256>}, {pipeline_mode = #tpu.pipeline_mode<synchronous>, transform_indices = @transform_4, window_bounds = array<i64: 128, 1>}, {pipeline_mode = #tpu.pipeline_mode<synchronous>, transform_indices = @transform_5, window_bounds = array<i64: 128, 128>}, {pipeline_mode = #tpu.pipeline_mode<synchronous>, transform_indices = @transform_6, window_bounds = array<i64: 128, 1>}, {pipeline_mode = #tpu.pipeline_mode<synchronous>, transform_indices = @transform_7, window_bounds = array<i64: 128, 1>}, {pipeline_mode = #tpu.pipeline_mode<synchronous>, transform_indices = @transform_8, window_bounds = array<i64: 1, 1>}, {transform_indices = @transform_9, window_bounds = array<i64: 8, 128>}]} {
    %c0 = arith.constant 0 : index
    %c0_0 = arith.constant 0 : index
    %0 = vector.load %arg2[%c0, %c0_0] : memref<256x128xbf16, #tpu.memory_space<vmem>>, vector<256x128xbf16>
    %c0_1 = arith.constant 0 : index
    %c0_2 = arith.constant 0 : index
    %1 = vector.load %arg1[%c0_1, %c0_2] : memref<128x128xbf16, #tpu.memory_space<vmem>>, vector<128x128xbf16>
    %cst = arith.constant dense<0.000000e+00> : vector<256x128xf32>
    %2 = tpu.matmul %0, %1, %cst {dimension_numbers = #tpu.dot_dimension_numbers<[1], [0], [0], [1], [0, 0, 1, 1], [], []>} : vector<256x128xbf16>, vector<128x128xbf16>, vector<256x128xf32> -> vector<256x128xf32>
    %c0_3 = arith.constant 0 : index
    %c0_4 = arith.constant 0 : index
    %3 = vector.load %arg3[%c0_3, %c0_4] : memref<256x1xf32, #tpu.memory_space<vmem>>, vector<256x1xf32>
    %4 = vector.broadcast %3 : vector<256x1xf32> to vector<256x128xf32>
    %5 = arith.addf %2, %4 : vector<256x128xf32>
    %cst_5 = arith.constant 2.000000e-01 : f32
    %6 = vector.broadcast %cst_5 : f32 to vector<256x128xf32>
    %7 = arith.mulf %6, %5 : vector<256x128xf32>
    %8 = arith.maximumf %5, %7 : vector<256x128xf32>
    %c0_6 = arith.constant 0 : index
    %c0_7 = arith.constant 0 : index
    %9 = vector.load %arg4[%c0_6, %c0_7] : memref<128x256xbf16, #tpu.memory_space<vmem>>, vector<128x256xbf16>
    %10 = arith.truncf %8 : vector<256x128xf32> to vector<256x128xbf16>
    %cst_8 = arith.constant dense<0.000000e+00> : vector<128x128xf32>
    %11 = tpu.matmul %9, %10, %cst_8 {dimension_numbers = #tpu.dot_dimension_numbers<[1], [0], [0], [1], [0, 0, 1, 1], [], []>} : vector<128x256xbf16>, vector<256x128xbf16>, vector<128x128xf32> -> vector<128x128xf32>
    %c0_9 = arith.constant 0 : index
    %c0_10 = arith.constant 0 : index
    %12 = vector.load %arg5[%c0_9, %c0_10] : memref<128x1xf32, #tpu.memory_space<vmem>>, vector<128x1xf32>
    %13 = vector.broadcast %12 : vector<128x1xf32> to vector<128x128xf32>
    %14 = arith.addf %11, %13 : vector<128x128xf32>
    %cst_11 = arith.constant 2.000000e-01 : f32
    %15 = vector.broadcast %cst_11 : f32 to vector<128x128xf32>
    %16 = arith.mulf %15, %14 : vector<128x128xf32>
    %17 = arith.maximumf %14, %16 : vector<128x128xf32>
    %c0_12 = arith.constant 0 : index
    %c0_13 = arith.constant 0 : index
    %18 = vector.load %arg6[%c0_12, %c0_13] : memref<128x128xbf16, #tpu.memory_space<vmem>>, vector<128x128xbf16>
    %19 = arith.truncf %17 : vector<128x128xf32> to vector<128x128xbf16>
    %cst_14 = arith.constant dense<0.000000e+00> : vector<128x128xf32>
    %20 = tpu.matmul %18, %19, %cst_14 {dimension_numbers = #tpu.dot_dimension_numbers<[1], [0], [0], [1], [0, 0, 1, 1], [], []>} : vector<128x128xbf16>, vector<128x128xbf16>, vector<128x128xf32> -> vector<128x128xf32>
    %c0_15 = arith.constant 0 : index
    %c0_16 = arith.constant 0 : index
    %21 = vector.load %arg7[%c0_15, %c0_16] : memref<128x1xf32, #tpu.memory_space<vmem>>, vector<128x1xf32>
    %22 = vector.broadcast %21 : vector<128x1xf32> to vector<128x128xf32>
    %23 = arith.addf %20, %22 : vector<128x128xf32>
    %cst_17 = arith.constant 2.000000e-01 : f32
    %24 = vector.broadcast %cst_17 : f32 to vector<128x128xf32>
    %25 = arith.mulf %24, %23 : vector<128x128xf32>
    %26 = arith.maximumf %23, %25 : vector<128x128xf32>
    %c0_18 = arith.constant 0 : index
    %c0_19 = arith.constant 0 : index
    %27 = vector.load %arg8[%c0_18, %c0_19] : memref<128x1xf32, #tpu.memory_space<vmem>>, vector<128x1xf32>
    %28 = vector.broadcast %27 : vector<128x1xf32> to vector<128x128xf32>
    %29 = arith.mulf %26, %28 : vector<128x128xf32>
    %cst_20 = arith.constant dense<0.000000e+00> : vector<128xf32>
    %30 = vector.multi_reduction <add>, %29, %cst_20 [0] : vector<128x128xf32> to vector<128xf32>
    %31 = vector.shape_cast %30 : vector<128xf32> to vector<1x128xf32>
    %c0_21 = arith.constant 0 : index
    %c0_22 = arith.constant 0 : index
    %32 = vector.load %arg9[%c0_21, %c0_22] : memref<1x1xf32, #tpu.memory_space<vmem>>, vector<1x1xf32>
    %33 = vector.broadcast %32 : vector<1x1xf32> to vector<1x128xf32>
    %34 = arith.addf %31, %33 : vector<1x128xf32>
    %35 = vector.shape_cast %34 : vector<1x128xf32> to vector<1x128xf32>
    %36 = vector.broadcast %35 : vector<1x128xf32> to vector<8x128xf32>
    %c0_23 = arith.constant 0 : index
    %c0_24 = arith.constant 0 : index
    %37 = vector.load %arg10[%c0_23, %c0_24] : memref<8x128xf32, #tpu.memory_space<vmem>>, vector<8x128xf32>
    tpu.vector_store %arg10[%c0_23, %c0_24], %36 {strides = array<i32>} : memref<8x128xf32, #tpu.memory_space<vmem>>, vector<8x128xf32>,
    return
  }
  func.func @transform_0(%arg0: i32) -> (i32, i32) {
    %c0_i32 = arith.constant 0 : i32
    %c0_i32_0 = arith.constant 0 : i32
    return %c0_i32, %arg0 : i32, i32
  }
  func.func @transform_1(%arg0: i32) -> (i32, i32) {
    %c0_i32 = arith.constant 0 : i32
    %c0_i32_0 = arith.constant 0 : i32
    %c0_i32_1 = arith.constant 0 : i32
    return %c0_i32, %c0_i32_0 : i32, i32
  }
  func.func @transform_2(%arg0: i32) -> (i32, i32) {
    %c0_i32 = arith.constant 0 : i32
    %c0_i32_0 = arith.constant 0 : i32
    %c0_i32_1 = arith.constant 0 : i32
    return %c0_i32, %c0_i32_0 : i32, i32
  }
  func.func @transform_3(%arg0: i32) -> (i32, i32) {
    %c0_i32 = arith.constant 0 : i32
    %c0_i32_0 = arith.constant 0 : i32
    %c0_i32_1 = arith.constant 0 : i32
    return %c0_i32, %c0_i32_0 : i32, i32
  }
  func.func @transform_4(%arg0: i32) -> (i32, i32) {
    %c0_i32 = arith.constant 0 : i32
    %c0_i32_0 = arith.constant 0 : i32
    %c0_i32_1 = arith.constant 0 : i32
    return %c0_i32, %c0_i32_0 : i32, i32
  }
  func.func @transform_5(%arg0: i32) -> (i32, i32) {
    %c0_i32 = arith.constant 0 : i32
    %c0_i32_0 = arith.constant 0 : i32
    %c0_i32_1 = arith.constant 0 : i32
    return %c0_i32, %c0_i32_0 : i32, i32
  }
  func.func @transform_6(%arg0: i32) -> (i32, i32) {
    %c0_i32 = arith.constant 0 : i32
    %c0_i32_0 = arith.constant 0 : i32
    %c0_i32_1 = arith.constant 0 : i32
    return %c0_i32, %c0_i32_0 : i32, i32
  }
  func.func @transform_7(%arg0: i32) -> (i32, i32) {
    %c0_i32 = arith.constant 0 : i32
    %c0_i32_0 = arith.constant 0 : i32
    %c0_i32_1 = arith.constant 0 : i32
    return %c0_i32, %c0_i32_0 : i32, i32
  }
  func.func @transform_8(%arg0: i32) -> (i32, i32) {
    %c0_i32 = arith.constant 0 : i32
    %c0_i32_0 = arith.constant 0 : i32
    %c0_i32_1 = arith.constant 0 : i32
    return %c0_i32, %c0_i32_0 : i32, i32
  }
  func.func @transform_9(%arg0: i32) -> (i32, i32) {
    %c0_i32 = arith.constant 0 : i32
    %c0_i32_0 = arith.constant 0 : i32
    return %c0_i32, %arg0 : i32, i32
  }
}

</mosaic_0001>

<bundles_post_ra>
// kernel: tpu_custom_call.1
= control target key start
LH: loop header
LB: loop body
LE: loop exit
PB: predicated region body
PF: predicated region fallthrough
CT: control target
= control target key end

     0   :  { %s2305_s0 = inlined_call_operand.vmem [shape: bf16[128,128], index: 0, kind: input, shape index: {}]   ;;  %s2306_s1 = inlined_call_operand.vmem [shape: bf16[256,128], index: 1, kind: input, shape index: {}]   ;;  %s2307_s2 = inlined_call_operand.vmem [shape: f32[256,1], index: 2, kind: input, shape index: {}]   ;;  %s2308_s3 = inlined_call_operand.vmem [shape: bf16[128,256], index: 3, kind: input, shape index: {}]   ;;  %s2309_s4 = inlined_call_operand.vmem [shape: f32[128,1], index: 4, kind: input, shape index: {}]   ;;  %s2310_s5 = inlined_call_operand.vmem [shape: bf16[128,128], index: 5, kind: input, shape index: {}]   ;;  %s2311_s6 = inlined_call_operand.vmem [shape: f32[128,1], index: 6, kind: input, shape index: {}]   ;;  %s2312_s7 = inlined_call_operand.vmem [shape: f32[128,1], index: 7, kind: input, shape index: {}]   ;;  %s2313_s8 = inlined_call_operand.<no memory space> [shape: f32[1,1], index: 8, kind: input, shape index: {}]   ;;  %s2314_s9 = inlined_call_operand.hbm [shape: f32[8,128], index: 9, kind: output, shape index: {}]  }
   0x1   :  { %v14_v0 = vstv %s2313_s8 }
   0x2   :  { %15 = vst [vmem:[#allocation2] sm:$0x1] %v14_v0 }
   0x3   :  { %v100_v1 = vld [vmem:[%s2307_s2 + $0x80] sm:$0xff]  ;;  %v1770_v3 = vmov 0   ;;  %v101_v5 = vld [vmem:[%s2307_s2 + $0x88] sm:$0xff]  ;;  %v1692_v8 = vld [vmem:[%s2305_s0 + $0x10] sm:$0xff]  }
   0x4   :  { %v84_v2 = vld [vmem:[%s2307_s2] sm:$0xff]  ;;  %1689 = vset.pattern.permute.xlu1 %v1770_v3  ;;  %1688 = vset.pattern.permute.xlu0 %v1770_v3  ;;  %v85_v6 = vld [vmem:[%s2307_s2 + $0x8] sm:$0xff]  ;;  %v102_v9 = vld [vmem:[%s2307_s2 + $0x90] sm:$0xff] }
   0x5   :  { %v1690_v4 = vld [vmem:[%s2305_s0] sm:$0xff]   ;;  %198 = vperm.xlu0 %1688, %v100_v1   ;;  %118 = vperm.xlu1 %1689, %v84_v2   ;;  %v1691_v7 = vld [vmem:[%s2305_s0 + $0x8] sm:$0xff]   ;;  %v103_v10 = vld [vmem:[%s2307_s2 + $0x98] sm:$0xff] }
   0x6   :  { %1590 = vmatprep.subr.bf16.mxu0 %v1690_v4  ;;  %v1693_v11 = vld [vmem:[%s2305_s0 + $0x18] sm:$0xff]   ;;  %v86_v12 = vld [vmem:[%s2307_s2 + $0x10] sm:$0xff]  ;;  %v104_v14 = vld [vmem:[%s2307_s2 + $0xa0] sm:$0xff] }
   0x7   :  { %1591 = vmatpush3.bf16.msra.mxu0 %v1690_v4  ;;  %v87_v13 = vld [vmem:[%s2307_s2 + $0x18] sm:$0xff]  ;;  %v1694_v15 = vld [vmem:[%s2305_s0 + $0x20] sm:$0xff]   ;;  %v105_v17 = vld [vmem:[%s2307_s2 + $0xa8] sm:$0xff] }
   0x8   :  { %1592 = vmatprep.subr.bf16.mxu0 %v1691_v7  ;;  %v1698_v16 = vld [vmem:[%s2306_s1] sm:$0xff]   ;;  %v1695_v18 = vld [vmem:[%s2305_s0 + $0x28] sm:$0xff]   ;;  %v1696_v21 = vld [vmem:[%s2305_s0 + $0x30] sm:$0xff]  }
   0x9   :  { %203 = vperm.xlu0 %1688, %v101_v5   ;;  %123 = vperm.xlu1 %1689, %v85_v6   ;;  %v88_v19 = vld [vmem:[%s2307_s2 + $0x20] sm:$0xff]  ;;  %v89_v20 = vld [vmem:[%s2307_s2 + $0x28] sm:$0xff]  ;;  %v106_v22 = vld [vmem:[%s2307_s2 + $0xb0] sm:$0xff] }
   0xa   :  { %1606 = vmatprep.mubr.bf16.mxu0 %v1698_v16  ;;  %v107_v23 = vld [vmem:[%s2307_s2 + $0xb8] sm:$0xff]  ;;  %v90_v25 = vld [vmem:[%s2307_s2 + $0x30] sm:$0xff]  ;;  %v108_v27 = vld [vmem:[%s2307_s2 + $0xc0] sm:$0xff] }
   0xb   :  { %1593 = vmatpush3.bf16.msra.mxu0 %v1691_v7  ;;  %v1697_v24 = vld [vmem:[%s2305_s0 + $0x38] sm:$0xff]   ;;  %v109_v28 = vld [vmem:[%s2307_s2 + $0xc8] sm:$0xff]  ;;  %v1700_v30 = vld [vmem:[%s2306_s1 + $0x10] sm:$0xff]  }
   0xc   :  { %1594 = vmatprep.subr.bf16.mxu0 %v1692_v8  ;;  %v91_v26 = vld [vmem:[%s2307_s2 + $0x38] sm:$0xff]  ;;  %v1699_v29 = vld [vmem:[%s2306_s1 + $0x8] sm:$0xff]   ;;  %v92_v31 = vld [vmem:[%s2307_s2 + $0x40] sm:$0xff] }
   0xd   :  { %208 = vperm.xlu0 %1688, %v102_v9   ;;  %213 = vperm.xlu1 %1689, %v103_v10   ;;  %v93_v32 = vld [vmem:[%s2307_s2 + $0x48] sm:$0xff]  ;;  %v110_v33 = vld [vmem:[%s2307_s2 + $0xd0] sm:$0xff]  ;;  %v111_v34 = vld [vmem:[%s2307_s2 + $0xd8] sm:$0xff] }
   0xe   :  { %v1701_v35 = vld [vmem:[%s2306_s1 + $0x18] sm:$0xff]   ;;  %v1702_v36 = vld [vmem:[%s2306_s1 + $0x20] sm:$0xff]   ;;  %v94_v37 = vld [vmem:[%s2307_s2 + $0x50] sm:$0xff] }
   0xf   :  { %1595 = vmatpush3.bf16.msra.mxu0 %v1692_v8  ;;  %v95_v38 = vld [vmem:[%s2307_s2 + $0x58] sm:$0xff]  ;;  %v112_v39 = vld [vmem:[%s2307_s2 + $0xe0] sm:$0xff]  ;;  %v113_v40 = vld [vmem:[%s2307_s2 + $0xe8] sm:$0xff] }
  0x10   :  { %1596 = vmatprep.subr.bf16.mxu0 %v1693_v11  ;;  %v1703_v41 = vld [vmem:[%s2306_s1 + $0x28] sm:$0xff]   ;;  %v1704_v42 = vld [vmem:[%s2306_s1 + $0x30] sm:$0xff]   ;;  %v96_v43 = vld [vmem:[%s2307_s2 + $0x60] sm:$0xff] }
  0x11   :  { %128 = vperm.xlu0 %1688, %v86_v12   ;;  %133 = vperm.xlu1 %1689, %v87_v13   ;;  %v97_v44 = vld [vmem:[%s2307_s2 + $0x68] sm:$0xff]  ;;  %v114_v45 = vld [vmem:[%s2307_s2 + $0xf0] sm:$0xff]  ;;  %v115_v46 = vld [vmem:[%s2307_s2 + $0xf8] sm:$0xff] }
  0x12   :  { %v1705_v47 = vld [vmem:[%s2306_s1 + $0x38] sm:$0xff]   ;;  %v1706_v48 = vld [vmem:[%s2306_s1 + $0x40] sm:$0xff]   ;;  %v98_v49 = vld [vmem:[%s2307_s2 + $0x70] sm:$0xff] }
  0x13   :  { %1597 = vmatpush3.bf16.msra.mxu0 %v1693_v11  ;;  %v99_v50 = vld [vmem:[%s2307_s2 + $0x78] sm:$0xff] }
  0x14   :  { %1598 = vmatprep.subr.bf16.mxu0 %v1694_v15 }
  0x15   :  { %218 = vperm.xlu0 %1688, %v104_v14   ;;  %223 = vperm.xlu1 %1689, %v105_v17  }
  0x17   :  { %1599 = vmatpush3.bf16.msra.mxu0 %v1694_v15 }
  0x18   :  { %1600 = vmatprep.subr.bf16.mxu0 %v1695_v18 }
  0x19   :  { %138 = vperm.xlu0 %1688, %v88_v19   ;;  %143 = vperm.xlu1 %1689, %v89_v20  }
  0x1b   :  { %1601 = vmatpush3.bf16.msra.mxu0 %v1695_v18 }
  0x1c   :  { %1602 = vmatprep.subr.bf16.mxu0 %v1696_v21 }
  0x1d   :  { %228 = vperm.xlu0 %1688, %v106_v22   ;;  %233 = vperm.xlu1 %1689, %v107_v23  }
  0x1f   :  { %1603 = vmatpush3.bf16.msra.mxu0 %v1696_v21 }
  0x20   :  { %1604 = vmatprep.subr.bf16.mxu0 %v1697_v24 }
  0x21   :  { %148 = vperm.xlu0 %1688, %v90_v25   ;;  %153 = vperm.xlu1 %1689, %v91_v26  }
  0x23   :  { %1605 = vmatpush3.bf16.msra.mxu0 %v1697_v24 }
  0x25   :  { %238 = vperm.xlu0 %1688, %v108_v27   ;;  %243 = vperm.xlu1 %1689, %v109_v28  }
  0x26   :  { %1607 = vmatmul.mubr.bf16.vlgmr.msra.gmra.mrb[0].mxu0 %v1699_v29 }
  0x27   :  { %1610 = vmatprep.mubr.bf16.mxu0 %v1700_v30 }
  0x29   :  { %158 = vperm.xlu0 %1688, %v92_v31   ;;  %163 = vperm.xlu1 %1689, %v93_v32  }
  0x2d   :  { %248 = vperm.xlu0 %1688, %v110_v33   ;;  %253 = vperm.xlu1 %1689, %v111_v34  }
  0x2e   :  { %1611 = vmatmul.mubr.bf16.gmra.mrb[4].mxu0 %v1701_v35 }
  0x2f   :  { %1614 = vmatprep.mubr.bf16.mxu0 %v1702_v36 }
  0x31   :  { %168 = vperm.xlu0 %1688, %v94_v37   ;;  %173 = vperm.xlu1 %1689, %v95_v38  }
  0x35   :  { %258 = vperm.xlu0 %1688, %v112_v39   ;;  %263 = vperm.xlu1 %1689, %v113_v40  }
  0x36   :  { %1615 = vmatmul.mubr.bf16.gmra.mrb[8].mxu0 %v1703_v41 }
  0x37   :  { %1618 = vmatprep.mubr.bf16.mxu0 %v1704_v42 }
  0x39   :  { %178 = vperm.xlu0 %1688, %v96_v43   ;;  %183 = vperm.xlu1 %1689, %v97_v44  }
  0x3d   :  { %268 = vperm.xlu0 %1688, %v114_v45   ;;  %273 = vperm.xlu1 %1689, %v115_v46  }
  0x3e   :  { %1619 = vmatmul.mubr.bf16.gmra.mrb[12].mxu0 %v1705_v47 }
  0x3f   :  { %1622 = vmatprep.mubr.bf16.mxu0 %v1706_v48 }
  0x40   :  { %16 = vsyncpa [#allocation4], 0  ;;  %v677_v51 = vld [vmem:[%s2309_s4] sm:$0xff]  ;;  %v678_v52 = vld [vmem:[%s2309_s4 + $0x8] sm:$0xff] }
  0x41   :  { %188 = vperm.xlu0 %1688, %v98_v49   ;;  %193 = vperm.xlu1 %1689, %v99_v50   ;;  %v1707_v53 = vld [vmem:[%s2306_s1 + $0x48] sm:$0xff]   ;;  %v1708_v54 = vld [vmem:[%s2306_s1 + $0x50] sm:$0xff]   ;;  %v680_v56 = vld [vmem:[%s2309_s4 + $0x18] sm:$0xff] }
  0x42   :  { %v679_v55 = vld [vmem:[%s2309_s4 + $0x10] sm:$0xff]  ;;  %v681_v57 = vld [vmem:[%s2309_s4 + $0x20] sm:$0xff]  ;;  %v682_v58 = vld [vmem:[%s2309_s4 + $0x28] sm:$0xff] }
  0x43   :  { %v1709_v59 = vld [vmem:[%s2306_s1 + $0x58] sm:$0xff]   ;;  %v1710_v60 = vld [vmem:[%s2306_s1 + $0x60] sm:$0xff]   ;;  %v683_v61 = vld [vmem:[%s2309_s4 + $0x30] sm:$0xff] }
  0x44   :  { %v684_v62 = vld [vmem:[%s2309_s4 + $0x38] sm:$0xff]  ;;  %v685_v63 = vld [vmem:[%s2309_s4 + $0x40] sm:$0xff]  ;;  %v686_v0 = vld [vmem:[%s2309_s4 + $0x48] sm:$0xff] }
  0x45   :  { %695 = vperm.xlu0 %1688, %v677_v51   ;;  %700 = vperm.xlu1 %1689, %v678_v52   ;;  %v1711_v1 = vld [vmem:[%s2306_s1 + $0x68] sm:$0xff]   ;;  %v1712_v2 = vld [vmem:[%s2306_s1 + $0x70] sm:$0xff]   ;;  %v688_v4 = vld [vmem:[%s2309_s4 + $0x58] sm:$0xff] }
  0x46   :  { %1623 = vmatmul.mubr.bf16.gmra.mrb[16].mxu0 %v1707_v53  ;;  %v687_v3 = vld [vmem:[%s2309_s4 + $0x50] sm:$0xff]  ;;  %v689_v5 = vld [vmem:[%s2309_s4 + $0x60] sm:$0xff]  ;;  %v690_v6 = vld [vmem:[%s2309_s4 + $0x68] sm:$0xff] }
  0x47   :  { %1626 = vmatprep.mubr.bf16.mxu0 %v1708_v54  ;;  %v1713_v7 = vld [vmem:[%s2306_s1 + $0x78] sm:$0xff]   ;;  %v691_v8 = vld [vmem:[%s2309_s4 + $0x70] sm:$0xff]  ;;  %v1006_v10 = vld [vmem:[%s2311_s6] sm:$0xff] }
  0x48   :  { %v692_v9 = vld [vmem:[%s2309_s4 + $0x78] sm:$0xff]  ;;  %v1007_v11 = vld [vmem:[%s2311_s6 + $0x8] sm:$0xff]  ;;  %v1008_v12 = vld [vmem:[%s2311_s6 + $0x10] sm:$0xff] }
  0x49   :  { %705 = vperm.xlu0 %1688, %v679_v55   ;;  %710 = vperm.xlu1 %1689, %v680_v56   ;;  %v1009_v13 = vld [vmem:[%s2311_s6 + $0x18] sm:$0xff]  ;;  %v1010_v14 = vld [vmem:[%s2311_s6 + $0x20] sm:$0xff]  ;;  %v1280_v16 = vld [vmem:[%s2312_s7 + $0x8] sm:$0xff] }
  0x4a   :  { %v1279_v15 = vld [vmem:[%s2312_s7] sm:$0xff]  ;;  %v1011_v17 = vld [vmem:[%s2311_s6 + $0x28] sm:$0xff]  ;;  %v1281_v18 = vld [vmem:[%s2312_s7 + $0x10] sm:$0xff] }
  0x4b   :  { %v1012_v19 = vld [vmem:[%s2311_s6 + $0x30] sm:$0xff]  ;;  %v1282_v20 = vld [vmem:[%s2312_s7 + $0x18] sm:$0xff]  ;;  %v1283_v22 = vld [vmem:[%s2312_s7 + $0x20] sm:$0xff] }
  0x4c   :  { %v1013_v21 = vld [vmem:[%s2311_s6 + $0x38] sm:$0xff]  ;;  %v1014_v23 = vld [vmem:[%s2311_s6 + $0x40] sm:$0xff]  ;;  %v1284_v24 = vld [vmem:[%s2312_s7 + $0x28] sm:$0xff] }
  0x4d   :  { %715 = vperm.xlu0 %1688, %v681_v57   ;;  %720 = vperm.xlu1 %1689, %v682_v58   ;;  %v1015_v25 = vld [vmem:[%s2311_s6 + $0x48] sm:$0xff]  ;;  %v1285_v26 = vld [vmem:[%s2312_s7 + $0x30] sm:$0xff]  ;;  %v1286_v28 = vld [vmem:[%s2312_s7 + $0x38] sm:$0xff] }
  0x4e   :  { %1627 = vmatmul.mubr.bf16.gmra.mrb[20].mxu0 %v1709_v59  ;;  %v1016_v27 = vld [vmem:[%s2311_s6 + $0x50] sm:$0xff]  ;;  %v1017_v29 = vld [vmem:[%s2311_s6 + $0x58] sm:$0xff]  ;;  %v1287_v30 = vld [vmem:[%s2312_s7 + $0x40] sm:$0xff] }
  0x4f   :  { %1630 = vmatprep.mubr.bf16.mxu0 %v1710_v60  ;;  %v1018_v31 = vld [vmem:[%s2311_s6 + $0x60] sm:$0xff]  ;;  %v1288_v32 = vld [vmem:[%s2312_s7 + $0x48] sm:$0xff]  ;;  %v1289_v34 = vld [vmem:[%s2312_s7 + $0x50] sm:$0xff] }
  0x50   :  { %v1019_v33 = vld [vmem:[%s2311_s6 + $0x68] sm:$0xff]  ;;  %v1020_v35 = vld [vmem:[%s2311_s6 + $0x70] sm:$0xff]  ;;  %v1290_v36 = vld [vmem:[%s2312_s7 + $0x58] sm:$0xff] }
  0x51   :  { %725 = vperm.xlu0 %1688, %v683_v61   ;;  %730 = vperm.xlu1 %1689, %v684_v62   ;;  %v1021_v37 = vld [vmem:[%s2311_s6 + $0x78] sm:$0xff]  ;;  %v1291_v38 = vld [vmem:[%s2312_s7 + $0x60] sm:$0xff]  ;;  %v1292_v39 = vld [vmem:[%s2312_s7 + $0x68] sm:$0xff] }
  0x52   :  { %v1293_v40 = vld [vmem:[%s2312_s7 + $0x70] sm:$0xff]  ;;  %v1294_v41 = vld [vmem:[%s2312_s7 + $0x78] sm:$0xff]  ;;  %v1412_v42 = vld [vmem:[#allocation2] sm:$0x1] }
  0x53   :  { %v1716_v48 = vld [vmem:[%s2308_s3 + $0x4] ss:$8 sps:$4 sm:$0xff]  }
  0x54   :  { %885 = vmatprep.mubr.bf16.mxu1 %v1716_v48 }
  0x55   :  { %735 = vperm.xlu0 %1688, %v685_v63   ;;  %740 = vperm.xlu1 %1689, %v686_v0  }
  0x56   :  { %1631 = vmatmul.mubr.bf16.gmra.mrb[24].mxu0 %v1711_v1 }
  0x57   :  { %1634 = vmatprep.mubr.bf16.mxu0 %v1712_v2 }
  0x59   :  { %745 = vperm.xlu0 %1688, %v687_v3   ;;  %750 = vperm.xlu1 %1689, %v688_v4  }
  0x5d   :  { %755 = vperm.xlu0 %1688, %v689_v5   ;;  %760 = vperm.xlu1 %1689, %v690_v6  }
  0x5e   :  { %1635 = vmatmul.mubr.bf16.gmra.mrb[28].mxu0 %v1713_v7 }
  0x61   :  { %765 = vperm.xlu0 %1688, %v691_v8   ;;  %770 = vperm.xlu1 %1689, %v692_v9  }
  0x65   :  { %1024 = vperm.xlu0 %1688, %v1006_v10   ;;  %1029 = vperm.xlu1 %1689, %v1007_v11  }
  0x69   :  { %1034 = vperm.xlu0 %1688, %v1008_v12   ;;  %1039 = vperm.xlu1 %1689, %v1009_v13  }
  0x6d   :  { %1044 = vperm.xlu0 %1688, %v1010_v14   ;;  %1297 = vperm.xlu1 %1689, %v1279_v15  }
  0x71   :  { %1302 = vperm.xlu0 %1688, %v1280_v16   ;;  %1049 = vperm.xlu1 %1689, %v1011_v17  }
  0x75   :  { %1307 = vperm.xlu0 %1688, %v1281_v18   ;;  %1054 = vperm.xlu1 %1689, %v1012_v19  }
  0x79   :  { %1312 = vperm.xlu0 %1688, %v1282_v20   ;;  %1059 = vperm.xlu1 %1689, %v1013_v21  }
  0x7d   :  { %1317 = vperm.xlu0 %1688, %v1283_v22   ;;  %1064 = vperm.xlu1 %1689, %v1014_v23  }
  0x81   :  { %1322 = vperm.xlu0 %1688, %v1284_v24   ;;  %1069 = vperm.xlu1 %1689, %v1015_v25  }
  0x84   :  { %v2137_v43 = vpop.permute.xlu0 %198  ;;  %v119_v44 = vpop.permute.xlu1 %118 }
  0x85   :  { %1327 = vperm.xlu0 %1688, %v1285_v26   ;;  %1074 = vperm.xlu1 %1689, %v1016_v27  }
  0x88   :  { %v2139_v45 = vpop.permute.xlu0 %203  ;;  %v124_v46 = vpop.permute.xlu1 %123 }
  0x89   :  { %1332 = vperm.xlu0 %1688, %v1286_v28   ;;  %1079 = vperm.xlu1 %1689, %v1017_v29  }
  0x8c   :  { %v2141_v47 = vpop.permute.xlu0 %208  ;;  %v2146_v49 = vpop.permute.xlu1 %213 }
  0x8d   :  { %1337 = vperm.xlu0 %1688, %v1287_v30   ;;  %1084 = vperm.xlu1 %1689, %v1018_v31  }
  0x90   :  { %v129_v50 = vpop.permute.xlu0 %128  ;;  %v134_v51 = vpop.permute.xlu1 %133 }
  0x91   :  { %1342 = vperm.xlu0 %1688, %v1288_v32   ;;  %1089 = vperm.xlu1 %1689, %v1019_v33  }
  0x94   :  { %v2148_v52 = vpop.permute.xlu0 %218  ;;  %v2150_v53 = vpop.permute.xlu1 %223 }
  0x95   :  { %1347 = vperm.xlu0 %1688, %v1289_v34   ;;  %1094 = vperm.xlu1 %1689, %v1020_v35  }
  0x98   :  { %v139_v54 = vpop.permute.xlu0 %138  ;;  %v144_v55 = vpop.permute.xlu1 %143 }
  0x99   :  { %1352 = vperm.xlu0 %1688, %v1290_v36   ;;  %1099 = vperm.xlu1 %1689, %v1021_v37  }
  0x9c   :  { %v2152_v56 = vpop.permute.xlu0 %228  ;;  %v2154_v57 = vpop.permute.xlu1 %233 }
  0x9d   :  { %1357 = vperm.xlu0 %1688, %v1291_v38   ;;  %1362 = vperm.xlu1 %1689, %v1292_v39  }
  0xa0   :  { %v149_v58 = vpop.permute.xlu0 %148  ;;  %v154_v59 = vpop.permute.xlu1 %153 }
  0xa1   :  { %1367 = vperm.xlu0 %1688, %v1293_v40   ;;  %1372 = vperm.xlu1 %1689, %v1294_v41  }
  0xa4   :  { %v2156_v60 = vpop.permute.xlu0 %238  ;;  %v2158_v61 = vpop.permute.xlu1 %243 }
  0xa5   :  { %1415 = vperm.xlu0 %1688, %v1412_v42  }
  0xa8   :  { %v159_v62 = vpop.permute.xlu0 %158  ;;  %v164_v63 = vpop.permute.xlu1 %163 }
  0xac   :  { %v2160_v0 = vpop.permute.xlu0 %248  ;;  %v2162_v1 = vpop.permute.xlu1 %253 }
  0xb0   :  { %v169_v2 = vpop.permute.xlu0 %168  ;;  %v174_v6 = vpop.permute.xlu1 %173 }
  0xb4   :  { %v2164_v15 = vpop.permute.xlu0 %258  ;;  %v2166_v19 = vpop.permute.xlu1 %263 }
  0xb8   :  { %v179_v31 = vpop.permute.xlu0 %178  ;;  %v184_v36 = vpop.permute.xlu1 %183 }
  0xf9   :  { %v1608_v3 = vpop.f32.mrb[0].mxu0 }
  0xfa   :  { %v463_v4 = vadd.f32 %v1608_v3, %v129_v50  ;;  %v454_v5 = vpop.f32.mrb[1].mxu0  ;;  %v2174_v50 = vpop.permute.xlu0 %268 }
  0xfb   :  { %v455_v7 = vadd.f32 %v454_v5, %v119_v44  ;;  %v1609_v8 = vpop.f32.mrb[2].mxu0 }
  0xfc   :  { %v583_v9 = vmul.f32 0.2, %v463_v4  ;;  %v466_v10 = vadd.f32 %v1609_v8, %v134_v51  ;;  %v457_v11 = vpop.f32.mrb[3].mxu0 }
  0xfd   :  { %v581_v12 = vmul.f32 0.2, %v455_v7  ;;  %v458_v14 = vadd.f32 %v457_v11, %v124_v46 }
  0xfe   :  { %v584_v13 = vmul.f32 0.2, %v466_v10  ;;  %v615_v16 = vmax.f32 %v463_v4, %v583_v9  ;;  %v189_v11 = vpop.permute.xlu0 %188 }
  0xff   :  { %v582_v18 = vmul.f32 0.2, %v458_v14  ;;  %v613_v21 = vmax.f32 %v455_v7, %v581_v12 }
 0x100   :  { %v616_v17 = vmax.f32 %v466_v10, %v584_v13 }
 0x101   :  { %v1612_v20 = vpop.f32.mrb[4].mxu0  ;;  %v614_v22 = vmax.f32 %v458_v14, %v582_v18 }
 0x102   :  { %v479_v23 = vadd.f32 %v1612_v20, %v149_v58  ;;  %v470_v24 = vpop.f32.mrb[5].mxu0  ;;  %v2168_v25 = vpack.c.bf16 %v616_v17, %v615_v16 }
 0x103   :  { %v471_v26 = vadd.f32 %v470_v24, %v139_v54  ;;  %v1613_v27 = vpop.f32.mrb[6].mxu0  ;;  %v2170_v30 = vpack.c.bf16 %v614_v22, %v613_v21 }
 0x104   :  { %v587_v28 = vmul.f32 0.2, %v479_v23  ;;  %v482_v29 = vadd.f32 %v1613_v27, %v154_v59  ;;  %v473_v32 = vpop.f32.mrb[7].mxu0 }
 0x105   :  { %v585_v33 = vmul.f32 0.2, %v471_v26  ;;  %v474_v35 = vadd.f32 %v473_v32, %v144_v55  ;;  %v2178_v55 = vpop.permute.xlu1 %273 }
 0x106   :  { %v588_v34 = vmul.f32 0.2, %v482_v29  ;;  %v619_v37 = vmax.f32 %v479_v23, %v587_v28 }
 0x107   :  { %v586_v39 = vmul.f32 0.2, %v474_v35  ;;  %v617_v41 = vmax.f32 %v471_v26, %v585_v33 }
 0x108   :  { %v620_v38 = vmax.f32 %v482_v29, %v588_v34 }
 0x109   :  { %v1616_v40 = vpop.f32.mrb[8].mxu0  ;;  %v618_v42 = vmax.f32 %v474_v35, %v586_v39 }
 0x10a   :  { %v495_v44 = vadd.f32 %v1616_v40, %v169_v2  ;;  %v486_v46 = vpop.f32.mrb[9].mxu0  ;;  %v2172_v48 = vpack.c.bf16 %v620_v38, %v619_v37 }
 0x10b   :  { %v487_v51 = vadd.f32 %v486_v46, %v159_v62  ;;  %v1617_v54 = vpop.f32.mrb[10].mxu0  ;;  %v2176_v3 = vpack.c.bf16 %v618_v42, %v617_v41 }
 0x10c   :  { %v591_v58 = vmul.f32 0.2, %v495_v44  ;;  %v498_v59 = vadd.f32 %v1617_v54, %v174_v6  ;;  %v489_v4 = vpop.f32.mrb[11].mxu0  ;;  %v194_v6 = vpop.permute.xlu1 %193 }
 0x10d   :  { %v589_v5 = vmul.f32 0.2, %v487_v51  ;;  %v490_v8 = vadd.f32 %v489_v4, %v164_v63 }
 0x10e   :  { %v592_v7 = vmul.f32 0.2, %v498_v59  ;;  %v623_v9 = vmax.f32 %v495_v44, %v591_v58 }
 0x10f   :  { %v590_v2 = vmul.f32 0.2, %v490_v8  ;;  %v621_v13 = vmax.f32 %v487_v51, %v589_v5 }
 0x110   :  { %v624_v10 = vmax.f32 %v498_v59, %v592_v7 }
 0x111   :  { %v1620_v12 = vpop.f32.mrb[12].mxu0  ;;  %v622_v14 = vmax.f32 %v490_v8, %v590_v2 }
 0x112   :  { %v511_v16 = vadd.f32 %v1620_v12, %v189_v11  ;;  %v502_v62 = vpop.f32.mrb[13].mxu0  ;;  %v2180_v17 = vpack.c.bf16 %v624_v10, %v623_v9 }
 0x113   :  { %v503_v18 = vadd.f32 %v502_v62, %v179_v31  ;;  %v1621_v20 = vpop.f32.mrb[14].mxu0  ;;  %v2182_v23 = vpack.c.bf16 %v622_v14, %v621_v13 }
 0x114   :  { %v595_v21 = vmul.f32 0.2, %v511_v16  ;;  %v514_v22 = vadd.f32 %v1621_v20, %v194_v6  ;;  %v505_v24 = vpop.f32.mrb[15].mxu0 }
 0x115   :  { %v593_v63 = vmul.f32 0.2, %v503_v18  ;;  %v506_v27 = vadd.f32 %v505_v24, %v184_v36 }
 0x116   :  { %v596_v26 = vmul.f32 0.2, %v514_v22  ;;  %v627_v28 = vmax.f32 %v511_v16, %v595_v21 }
 0x117   :  { %v594_v32 = vmul.f32 0.2, %v506_v27  ;;  %v625_v34 = vmax.f32 %v503_v18, %v593_v63 }
 0x118   :  { %v628_v29 = vmax.f32 %v514_v22, %v596_v26 }
 0x119   :  { %v1624_v33 = vpop.f32.mrb[16].mxu0  ;;  %v626_v35 = vmax.f32 %v506_v27, %v594_v32 }
 0x11a   :  { %v527_v37 = vadd.f32 %v1624_v33, %v2141_v47  ;;  %v518_v38 = vpop.f32.mrb[17].mxu0  ;;  %v2185_v39 = vpack.c.bf16 %v628_v29, %v627_v28 }
 0x11b   :  { %v519_v31 = vadd.f32 %v518_v38, %v2137_v43  ;;  %v1625_v40 = vpop.f32.mrb[18].mxu0  ;;  %v2189_v44 = vpack.c.bf16 %v626_v35, %v625_v34 }
 0x11c   :  { %v599_v41 = vmul.f32 0.2, %v527_v37  ;;  %v530_v42 = vadd.f32 %v1625_v40, %v2146_v49  ;;  %v521_v36 = vpop.f32.mrb[19].mxu0 }
 0x11d   :  { %v597_v46 = vmul.f32 0.2, %v519_v31  ;;  %v522_v54 = vadd.f32 %v521_v36, %v2139_v45 }
 0x11e   :  { %v600_v51 = vmul.f32 0.2, %v530_v42  ;;  %v631_v58 = vmax.f32 %v527_v37, %v599_v41 }
 0x11f   :  { %v598_v4 = vmul.f32 0.2, %v522_v54  ;;  %v629_v8 = vmax.f32 %v519_v31, %v597_v46 }
 0x120   :  { %v632_v59 = vmax.f32 %v530_v42, %v600_v51 }
 0x121   :  { %v1628_v47 = vpop.f32.mrb[20].mxu0  ;;  %v630_v43 = vmax.f32 %v522_v54, %v598_v4 }
 0x122   :  { %v543_v5 = vadd.f32 %v1628_v47, %v2152_v56  ;;  %v534_v7 = vpop.f32.mrb[21].mxu0  ;;  %v670_v9 = vpack.c.bf16 %v632_v59, %v631_v58  ;;  %v1725_v47 = vld [vmem:[%s2308_s3 + $0x30] ss:$8 sps:$4 sm:$0xff]  }
 0x123   :  { %v535_v10 = vadd.f32 %v534_v7, %v2148_v52  ;;  %v1629_v49 = vpop.f32.mrb[22].mxu0  ;;  %v669_v13 = vpack.c.bf16 %v630_v43, %v629_v8  ;;  %v1728_v7 = vld [vmem:[%s2308_s3 + $0x40] ss:$8 sps:$4 sm:$0xff]   ;;  %v1729_v8 = vld [vmem:[%s2308_s3 + $0x54] ss:$8 sps:$4 sm:$0xff]  }
 0x124   :  { %v603_v2 = vmul.f32 0.2, %v543_v5  ;;  %v546_v11 = vadd.f32 %v1629_v49, %v2154_v57  ;;  %v537_v12 = vpop.f32.mrb[23].mxu0  ;;  %v1731_v43 = vld [vmem:[%s2308_s3 + $0x50] ss:$8 sps:$4 sm:$0xff]  }
 0x125   :  { %v601_v14 = vmul.f32 0.2, %v535_v10  ;;  %v538_v45 = vadd.f32 %v537_v12, %v2150_v53  ;;  %1510 = vmatprep.subr.bf16.mxu1 %v669_v13  ;;  %v1735_v49 = vld [vmem:[%s2308_s3 + $0x74] ss:$8 sps:$4 sm:$0xff]   ;;  %v1739_v12 = vld [vmem:[%s2310_s5 + $0x20] sm:$0xff]  }
 0x126   :  { %v604_v16 = vmul.f32 0.2, %v546_v11  ;;  %1511 = vmatpush3.bf16.msra.mxu1 %v2170_v30  ;;  %v635_v56 = vmax.f32 %v543_v5, %v603_v2  ;;  %v1726_v5 = vld [vmem:[%s2308_s3 + $0x44] ss:$8 sps:$4 sm:$0xff]   ;;  %v1737_v2 = vld [vmem:[%s2308_s3 + $0x70] ss:$8 sps:$4 sm:$0xff]  }
 0x127   :  { %v602_v62 = vmul.f32 0.2, %v538_v45  ;;  %1512 = vmatprep.subr.bf16.mxu1 %v670_v9  ;;  %v633_v18 = vmax.f32 %v535_v10, %v601_v14  ;;  %v1732_v9 = vld [vmem:[%s2308_s3 + $0x64] ss:$8 sps:$4 sm:$0xff]   ;;  %v1734_v10 = vld [vmem:[%s2308_s3 + $0x60] ss:$8 sps:$4 sm:$0xff]  }
 0x128   :  { %v636_v6 = vmax.f32 %v546_v11, %v604_v16  ;;  %v1738_v11 = vld [vmem:[%s2310_s5] sm:$0xff]  }
 0x129   :  { %v634_v20 = vmax.f32 %v538_v45, %v602_v62  ;;  %v1632_v52 = vpop.f32.mrb[24].mxu0  ;;  %1654 = vmatprep.mubr.bf16.mxu0 %v1738_v11  ;;  %v696_v62 = vpop.permute.xlu0 %695 }
 0x12a   :  { %v559_v21 = vadd.f32 %v1632_v52, %v2160_v0  ;;  %v550_v22 = vpop.f32.mrb[25].mxu0  ;;  %v672_v57 = vpack.c.bf16 %v636_v6, %v635_v56  ;;  %1513 = vmatpush3.bf16.msra.mxu1 %v2168_v25 }
 0x12b   :  { %v551_v24 = vadd.f32 %v550_v22, %v2156_v60  ;;  %v1633_v53 = vpop.f32.mrb[26].mxu0  ;;  %v671_v63 = vpack.c.bf16 %v634_v20, %v633_v18  ;;  %v701_v20 = vpop.permute.xlu1 %700 }
 0x12c   :  { %v607_v26 = vmul.f32 0.2, %v559_v21  ;;  %v562_v27 = vadd.f32 %v1633_v53, %v2162_v1  ;;  %v553_v30 = vpop.f32.mrb[27].mxu0 }
 0x12d   :  { %v605_v28 = vmul.f32 0.2, %v551_v24  ;;  %v554_v29 = vadd.f32 %v553_v30, %v2158_v61  ;;  %1514 = vmatprep.subr.bf16.mxu1 %v671_v63  ;;  %v706_v30 = vpop.permute.xlu0 %705 }
 0x12e   :  { %v608_v32 = vmul.f32 0.2, %v562_v27  ;;  %1515 = vmatpush3.bf16.msra.mxu1 %v2176_v3  ;;  %v639_v0 = vmax.f32 %v559_v21, %v607_v26 }
 0x12f   :  { %v606_v33 = vmul.f32 0.2, %v554_v29  ;;  %1516 = vmatprep.subr.bf16.mxu1 %v672_v57  ;;  %v637_v60 = vmax.f32 %v551_v24, %v605_v28 }
 0x130   :  { %v640_v34 = vmax.f32 %v562_v27, %v608_v32 }
 0x131   :  { %v638_v35 = vmax.f32 %v554_v29, %v606_v33  ;;  %v1636_v25 = vpop.f32.mrb[28].mxu0 }
 0x132   :  { %v575_v37 = vadd.f32 %v1636_v25, %v2174_v50  ;;  %v566_v38 = vpop.f32.mrb[29].mxu0  ;;  %v674_v31 = vpack.c.bf16 %v640_v34, %v639_v0  ;;  %1517 = vmatpush3.bf16.msra.mxu1 %v2172_v48  ;;  %v711_v0 = vpop.permute.xlu1 %710 }
 0x133   :  { %v567_v1 = vadd.f32 %v566_v38, %v2164_v15  ;;  %v1637_v61 = vpop.f32.mrb[30].mxu0  ;;  %v673_v40 = vpack.c.bf16 %v638_v35, %v637_v60 }
 0x134   :  { %v611_v41 = vmul.f32 0.2, %v575_v37  ;;  %v578_v42 = vadd.f32 %v1637_v61, %v2178_v55  ;;  %v569_v3 = vpop.f32.mrb[31].mxu0  ;;  %v1717_v55 = vld [vmem:[%s2308_s3 + $0x14] ss:$8 sps:$4 sm:$0xff]  }
 0x135   :  { %v609_v36 = vmul.f32 0.2, %v567_v1  ;;  %v570_v46 = vadd.f32 %v569_v3, %v2166_v19  ;;  %1518 = vmatprep.subr.bf16.mxu1 %v673_v40  ;;  %v1714_v19 = vld [vmem:[%s2308_s3] ss:$8 sps:$4 sm:$0xff]   ;;  %v716_v40 = vpop.permute.xlu0 %715 }
 0x136   :  { %v612_v51 = vmul.f32 0.2, %v578_v42  ;;  %1519 = vmatpush3.bf16.msra.mxu1 %v2182_v23  ;;  %v643_v50 = vmax.f32 %v575_v37, %v611_v41  ;;  %v1720_v23 = vld [vmem:[%s2308_s3 + $0x24] ss:$8 sps:$4 sm:$0xff]  }
 0x137   :  { %v610_v54 = vmul.f32 0.2, %v570_v46  ;;  %1520 = vmatprep.subr.bf16.mxu1 %v674_v31  ;;  %v641_v15 = vmax.f32 %v567_v1, %v609_v36 }
 0x138   :  { %v644_v58 = vmax.f32 %v578_v42, %v612_v51 }
 0x139   :  { %v642_v59 = vmax.f32 %v570_v46, %v610_v54  ;;  %v721_v46 = vpop.permute.xlu1 %720 }
 0x13a   :  { %v676_v48 = vpack.c.bf16 %v644_v58, %v643_v50  ;;  %1521 = vmatpush3.bf16.msra.mxu1 %v2180_v17  ;;  %v1719_v17 = vld [vmem:[%s2308_s3 + $0x10] ss:$8 sps:$4 sm:$0xff]  }
 0x13b   :  { %v675_v4 = vpack.c.bf16 %v642_v59, %v641_v15 }
 0x13d   :  { %1522 = vmatprep.subr.bf16.mxu1 %v675_v4 }
 0x13e   :  { %1523 = vmatpush3.bf16.msra.mxu1 %v2189_v44  ;;  %v1723_v44 = vld [vmem:[%s2308_s3 + $0x34] ss:$8 sps:$4 sm:$0xff]  }
 0x13f   :  { %1524 = vmatprep.subr.bf16.mxu1 %v676_v48 }
 0x142   :  { %1525 = vmatpush3.bf16.msra.mxu1 %v2185_v39  ;;  %v1722_v39 = vld [vmem:[%s2308_s3 + $0x20] ss:$8 sps:$4 sm:$0xff]  }
 0x145   :  { %886 = vmatmul.mubr.bf16.vlgmr.msra.gmra.mrb[0].mxu1 %v1714_v19 }
 0x146   :  { %893 = vmatprep.mubr.bf16.mxu1 %v1717_v55  ;;  %v726_v55 = vpop.permute.xlu0 %725 }
 0x14d   :  { %894 = vmatmul.mubr.bf16.gmra.mrb[4].mxu1 %v1719_v17 }
 0x14e   :  { %901 = vmatprep.mubr.bf16.mxu1 %v1720_v23 }
 0x155   :  { %902 = vmatmul.mubr.bf16.gmra.mrb[8].mxu1 %v1722_v39 }
 0x156   :  { %909 = vmatprep.mubr.bf16.mxu1 %v1723_v44 }
 0x15d   :  { %910 = vmatmul.mubr.bf16.gmra.mrb[12].mxu1 %v1725_v47  ;;  %v731_v47 = vpop.permute.xlu1 %730 }
 0x15e   :  { %917 = vmatprep.mubr.bf16.mxu1 %v1726_v5 }
 0x165   :  { %918 = vmatmul.mubr.bf16.gmra.mrb[16].mxu1 %v1728_v7 }
 0x166   :  { %925 = vmatprep.mubr.bf16.mxu1 %v1729_v8 }
 0x16d   :  { %926 = vmatmul.mubr.bf16.gmra.mrb[20].mxu1 %v1731_v43 }
 0x16e   :  { %933 = vmatprep.mubr.bf16.mxu1 %v1732_v9 }
 0x175   :  { %934 = vmatmul.mubr.bf16.gmra.mrb[24].mxu1 %v1734_v10 }
 0x176   :  { %941 = vmatprep.mubr.bf16.mxu1 %v1735_v49 }
 0x17d   :  { %942 = vmatmul.mubr.bf16.gmra.mrb[28].mxu1 %v1737_v2 }
 0x17e   :  { %1662 = vmatprep.mubr.bf16.mxu1 %v1739_v12  ;;  %v736_v12 = vpop.permute.xlu0 %735 }
 0x218   :  { %v1526_v13 = vpop.f32.mrb[0].mxu1 }
 0x219   :  { %v1527_v14 = vpop.f32.mrb[1].mxu1 }
 0x21a   :  { %v1528_v45 = vadd.f32 %v1527_v14, %v1526_v13  ;;  %v1529_v16 = vpop.f32.mrb[2].mxu1 }
 0x21b   :  { %v1530_v56 = vpop.f32.mrb[3].mxu1 }
 0x21c   :  { %v888_v6 = vadd.f32 %v1528_v45, %v696_v62  ;;  %v1531_v18 = vadd.f32 %v1530_v56, %v1529_v16  ;;  %v741_v62 = vpop.permute.xlu1 %740 }
 0x21e   :  { %v950_v52 = vmul.f32 0.2, %v888_v6  ;;  %v891_v21 = vadd.f32 %v1531_v18, %v701_v20 }
 0x220   :  { %v951_v22 = vmul.f32 0.2, %v891_v21  ;;  %v1532_v57 = vpop.f32.mrb[4].mxu1  ;;  %v966_v53 = vmax.f32 %v888_v6, %v950_v52 }
 0x221   :  { %v1533_v24 = vpop.f32.mrb[5].mxu1 }
 0x222   :  { %v967_v63 = vmax.f32 %v891_v21, %v951_v22  ;;  %v1534_v26 = vadd.f32 %v1533_v24, %v1532_v57  ;;  %v1535_v27 = vpop.f32.mrb[6].mxu1 }
 0x223   :  { %v1536_v28 = vpop.f32.mrb[7].mxu1 }
 0x224   :  { %v998_v29 = vpack.c.bf16 %v967_v63, %v966_v53  ;;  %v896_v32 = vadd.f32 %v1534_v26, %v706_v30  ;;  %v1537_v33 = vadd.f32 %v1536_v28, %v1535_v27  ;;  %v746_v53 = vpop.permute.xlu0 %745  ;;  %v751_v28 = vpop.permute.xlu1 %750 }
 0x226   :  { %v952_v34 = vmul.f32 0.2, %v896_v32  ;;  %v899_v60 = vadd.f32 %v1537_v33, %v711_v0  ;;  %1638 = vmatprep.subr.bf16.mxu0 %v998_v29  ;;  %1670 = vmatprep.subr.bf16.mxu1 %v998_v29 }
 0x227   :  { %1639 = vmatpush3.bf16.msra.mxu0 %v998_v29  ;;  %1678 = vmatpush3.bf16.msra.mxu1 %v998_v29 }
 0x228   :  { %v953_v35 = vmul.f32 0.2, %v899_v60  ;;  %v1538_v25 = vpop.f32.mrb[8].mxu1  ;;  %v968_v38 = vmax.f32 %v896_v32, %v952_v34 }
 0x229   :  { %v1539_v37 = vpop.f32.mrb[9].mxu1 }
 0x22a   :  { %v969_v31 = vmax.f32 %v899_v60, %v953_v35  ;;  %v1540_v1 = vadd.f32 %v1539_v37, %v1538_v25  ;;  %v1541_v61 = vpop.f32.mrb[10].mxu1 }
 0x22b   :  { %v1542_v41 = vpop.f32.mrb[11].mxu1 }
 0x22c   :  { %v999_v42 = vpack.c.bf16 %v969_v31, %v968_v38  ;;  %v904_v3 = vadd.f32 %v1540_v1, %v716_v40  ;;  %v1543_v36 = vadd.f32 %v1542_v41, %v1541_v61  ;;  %v756_v38 = vpop.permute.xlu0 %755  ;;  %v761_v41 = vpop.permute.xlu1 %760 }
 0x22e   :  { %v954_v51 = vmul.f32 0.2, %v904_v3  ;;  %v907_v54 = vadd.f32 %v1543_v36, %v721_v46  ;;  %1640 = vmatprep.subr.bf16.mxu0 %v999_v42  ;;  %1671 = vmatprep.subr.bf16.mxu1 %v999_v42 }
 0x22f   :  { %1641 = vmatpush3.bf16.msra.mxu0 %v999_v42  ;;  %1679 = vmatpush3.bf16.msra.mxu1 %v999_v42 }
 0x230   :  { %v955_v50 = vmul.f32 0.2, %v907_v54  ;;  %v1544_v58 = vpop.f32.mrb[12].mxu1  ;;  %v970_v59 = vmax.f32 %v904_v3, %v954_v51 }
 0x231   :  { %v1545_v15 = vpop.f32.mrb[13].mxu1 }
 0x232   :  { %v971_v48 = vmax.f32 %v907_v54, %v955_v50  ;;  %v1546_v4 = vadd.f32 %v1545_v15, %v1544_v58  ;;  %v1547_v19 = vpop.f32.mrb[14].mxu1 }
 0x233   :  { %v1548_v17 = vpop.f32.mrb[15].mxu1 }
 0x234   :  { %v1000_v23 = vpack.c.bf16 %v971_v48, %v970_v59  ;;  %v912_v39 = vadd.f32 %v1546_v4, %v726_v55  ;;  %v1549_v44 = vadd.f32 %v1548_v17, %v1547_v19  ;;  %v766_v59 = vpop.permute.xlu0 %765  ;;  %v771_v17 = vpop.permute.xlu1 %770 }
 0x236   :  { %v956_v5 = vmul.f32 0.2, %v912_v39  ;;  %v915_v7 = vadd.f32 %v1549_v44, %v731_v47  ;;  %1642 = vmatprep.subr.bf16.mxu0 %v1000_v23  ;;  %1672 = vmatprep.subr.bf16.mxu1 %v1000_v23 }
 0x237   :  { %1643 = vmatpush3.bf16.msra.mxu0 %v1000_v23  ;;  %1680 = vmatpush3.bf16.msra.mxu1 %v1000_v23 }
 0x238   :  { %v957_v8 = vmul.f32 0.2, %v915_v7  ;;  %v1550_v43 = vpop.f32.mrb[16].mxu1  ;;  %v972_v10 = vmax.f32 %v912_v39, %v956_v5 }
 0x239   :  { %v1551_v9 = vpop.f32.mrb[17].mxu1 }
 0x23a   :  { %v973_v49 = vmax.f32 %v915_v7, %v957_v8  ;;  %v1552_v2 = vadd.f32 %v1551_v9, %v1550_v43  ;;  %v1553_v11 = vpop.f32.mrb[18].mxu1  ;;  %v1740_v8 = vld [vmem:[%s2310_s5 + $0x8] sm:$0xff]   ;;  %v1742_v9 = vld [vmem:[%s2310_s5 + $0x10] sm:$0xff]  }
 0x23b   :  { %v1554_v13 = vpop.f32.mrb[19].mxu1  ;;  %v1741_v43 = vld [vmem:[%s2310_s5 + $0x28] sm:$0xff]  }
 0x23c   :  { %v1001_v14 = vpack.c.bf16 %v973_v49, %v972_v10  ;;  %v920_v45 = vadd.f32 %v1552_v2, %v736_v12  ;;  %v1555_v16 = vadd.f32 %v1554_v13, %v1553_v11  ;;  %v1743_v10 = vld [vmem:[%s2310_s5 + $0x30] sm:$0xff]   ;;  %v1744_v49 = vld [vmem:[%s2310_s5 + $0x18] sm:$0xff]   ;;  %v1025_v11 = vpop.permute.xlu0 %1024  ;;  %v1030_v12 = vpop.permute.xlu1 %1029 }
 0x23d   :  { %v1745_v2 = vld [vmem:[%s2310_s5 + $0x38] sm:$0xff]   ;;  %s1771_s5 = smov [#allocation3]  }
 0x23e   :  { %v958_v56 = vmul.f32 0.2, %v920_v45  ;;  %v923_v6 = vadd.f32 %v1555_v16, %v741_v62  ;;  %1644 = vmatprep.subr.bf16.mxu0 %v1001_v14  ;;  %1673 = vmatprep.subr.bf16.mxu1 %v1001_v14  ;;  %s1430_s0 = sshll.u32 %s1771_s5, 4  ;;  %s1431_s0 = int_to_ptr.vmem [resolvable:$true] %s1430_s0 }
 0x23f   :  { %1645 = vmatpush3.bf16.msra.mxu0 %v1001_v14  ;;  %1681 = vmatpush3.bf16.msra.mxu1 %v1001_v14  ;;  %s1746_s1 = scalar_lea.vmem %s1431_s0, 128  ;;  %p1751_p1 = scmp.lt.s32.totalorder %s1431_s0, %s1431_s0 }
 0x240   :  { %v959_v18 = vmul.f32 0.2, %v923_v6  ;;  %v1556_v20 = vpop.f32.mrb[20].mxu1  ;;  %v974_v21 = vmax.f32 %v920_v45, %v958_v56  ;;  %v1035_v13 = vpop.permute.xlu0 %1034  ;;  %p1747_p0 = scmp.ne.s32.totalorder %s1431_s0, %s1746_s1  ;;  %p1752_p2 = scmp.lt.s32.totalorder %s1746_s1, %s1746_s1 }
 0x241   :  { %v1557_v52 = vpop.f32.mrb[21].mxu1  ;;  %v1040_v14 = vpop.permute.xlu1 %1039 }
 0x242   :  { %v975_v22 = vmax.f32 %v923_v6, %v959_v18  ;;  %v1558_v57 = vadd.f32 %v1557_v52, %v1556_v20  ;;  %v1559_v24 = vpop.f32.mrb[22].mxu1  ;;  %p1753_p3 = por %p1752_p2, %p1751_p1 }
 0x243   :  { %v1560_v63 = vpop.f32.mrb[23].mxu1 }
 0x244   :  { %v1002_v26 = vpack.c.bf16 %v975_v22, %v974_v21  ;;  %v928_v27 = vadd.f32 %v1558_v57, %v746_v53  ;;  %v1561_v30 = vadd.f32 %v1560_v63, %v1559_v24  ;;  %v1045_v45 = vpop.permute.xlu0 %1044  ;;  %p1754_p4 = pnand %p1753_p3, %p1747_p0 }
 0x245   :  { %v1298_v16 = vpop.permute.xlu1 %1297 }
 0x246   :  { %v960_v29 = vmul.f32 0.2, %v928_v27  ;;  %v931_v32 = vadd.f32 %v1561_v30, %v751_v28  ;;  %1646 = vmatprep.subr.bf16.mxu0 %v1002_v26  ;;  %1674 = vmatprep.subr.bf16.mxu1 %v1002_v26 }
 0x247   :  { %1647 = vmatpush3.bf16.msra.mxu0 %v1002_v26  ;;  %1682 = vmatpush3.bf16.msra.mxu1 %v1002_v26 }
 0x248   :  { %v961_v33 = vmul.f32 0.2, %v931_v32  ;;  %v1562_v0 = vpop.f32.mrb[24].mxu1  ;;  %v976_v60 = vmax.f32 %v928_v27, %v960_v29  ;;  %v1303_v62 = vpop.permute.xlu0 %1302 }
 0x249   :  { %v1563_v34 = vpop.f32.mrb[25].mxu1  ;;  %v1050_v56 = vpop.permute.xlu1 %1049 }
 0x24a   :  { %v977_v35 = vmax.f32 %v931_v32, %v961_v33  ;;  %v1564_v25 = vadd.f32 %v1563_v34, %v1562_v0  ;;  %v1565_v37 = vpop.f32.mrb[26].mxu1 }
 0x24b   :  { %v1566_v31 = vpop.f32.mrb[27].mxu1 }
 0x24c   :  { %v1003_v1 = vpack.c.bf16 %v977_v35, %v976_v60  ;;  %v936_v61 = vadd.f32 %v1564_v25, %v756_v38  ;;  %v1567_v40 = vadd.f32 %v1566_v31, %v1565_v37  ;;  %v1308_v6 = vpop.permute.xlu0 %1307 }
 0x24d   :  { %v1055_v18 = vpop.permute.xlu1 %1054 }
 0x24e   :  { %v962_v42 = vmul.f32 0.2, %v936_v61  ;;  %v939_v3 = vadd.f32 %v1567_v40, %v761_v41  ;;  %1648 = vmatprep.subr.bf16.mxu0 %v1003_v1  ;;  %1675 = vmatprep.subr.bf16.mxu1 %v1003_v1 }
 0x24f   :  { %1649 = vmatpush3.bf16.msra.mxu0 %v1003_v1  ;;  %1683 = vmatpush3.bf16.msra.mxu1 %v1003_v1 }
 0x250   :  { %v963_v36 = vmul.f32 0.2, %v939_v3  ;;  %v1568_v46 = vpop.f32.mrb[28].mxu1  ;;  %v978_v54 = vmax.f32 %v936_v61, %v962_v42  ;;  %v1313_v20 = vpop.permute.xlu0 %1312 }
 0x251   :  { %v1569_v51 = vpop.f32.mrb[29].mxu1  ;;  %v1060_v52 = vpop.permute.xlu1 %1059 }
 0x252   :  { %v979_v50 = vmax.f32 %v939_v3, %v963_v36  ;;  %v1570_v58 = vadd.f32 %v1569_v51, %v1568_v46  ;;  %v1571_v15 = vpop.f32.mrb[30].mxu1 }
 0x253   :  { %v1572_v48 = vpop.f32.mrb[31].mxu1 }
 0x254   :  { %v1004_v4 = vpack.c.bf16 %v979_v50, %v978_v54  ;;  %v944_v19 = vadd.f32 %v1570_v58, %v766_v59  ;;  %v1573_v55 = vadd.f32 %v1572_v48, %v1571_v15  ;;  %v1318_v21 = vpop.permute.xlu0 %1317 }
 0x255   :  { %v1065_v22 = vpop.permute.xlu1 %1064 }
 0x256   :  { %v964_v23 = vmul.f32 0.2, %v944_v19  ;;  %v947_v39 = vadd.f32 %v1573_v55, %v771_v17  ;;  %1650 = vmatprep.subr.bf16.mxu0 %v1004_v4  ;;  %1676 = vmatprep.subr.bf16.mxu1 %v1004_v4 }
 0x257   :  { %1651 = vmatpush3.bf16.msra.mxu0 %v1004_v4  ;;  %1684 = vmatpush3.bf16.msra.mxu1 %v1004_v4 }
 0x258   :  { %v965_v44 = vmul.f32 0.2, %v947_v39  ;;  %v980_v47 = vmax.f32 %v944_v19, %v964_v23  ;;  %v2281_v57 = vpop.permute.xlu0 %1322 }
 0x259   :  { %v1070_v24 = vpop.permute.xlu1 %1069 }
 0x25a   :  { %v981_v5 = vmax.f32 %v947_v39, %v965_v44 }
 0x25c   :  { %v1005_v7 = vpack.c.bf16 %v981_v5, %v980_v47  ;;  %v2283_v53 = vpop.permute.xlu0 %1327 }
 0x25d   :  { %v1075_v63 = vpop.permute.xlu1 %1074 }
 0x25e   :  { %1652 = vmatprep.subr.bf16.mxu0 %v1005_v7  ;;  %1677 = vmatprep.subr.bf16.mxu1 %v1005_v7 }
 0x25f   :  { %1653 = vmatpush3.bf16.msra.mxu0 %v1005_v7  ;;  %1685 = vmatpush3.bf16.msra.mxu1 %v1005_v7 }
 0x260   :  { %v2285_v26 = vpop.permute.xlu0 %1332 }
 0x261   :  { %v1080_v27 = vpop.permute.xlu1 %1079 }
 0x262   :  { %1655 = vmatmul.mubr.bf16.vlgmr.msra.gmra.mrb[32].mxu0 %v1740_v8  ;;  %1663 = vmatmul.mubr.bf16.vlgmr.msra.gmra.mrb[32].mxu1 %v1741_v43 }
 0x263   :  { %1658 = vmatprep.mubr.bf16.mxu0 %v1742_v9  ;;  %1666 = vmatprep.mubr.bf16.mxu1 %v1743_v10 }
 0x264   :  { %v2287_v30 = vpop.permute.xlu0 %1337 }
 0x265   :  { %v1085_v3 = vpop.permute.xlu1 %1084 }
 0x268   :  { %v1343_v36 = vpop.permute.xlu0 %1342 }
 0x26a   :  { %1659 = vmatmul.mubr.bf16.gmra.mrb[36].mxu0 %v1744_v49  ;;  %1667 = vmatmul.mubr.bf16.gmra.mrb[36].mxu1 %v1745_v2  ;;  %v1090_v49 = vpop.permute.xlu1 %1089 }
 0x335   :  { %v1656_v28 = vpop.f32.mrb[32].mxu0  ;;  %v1664_v29 = vpop.f32.mrb[32].mxu1 }
 0x336   :  { %v1193_v32 = vadd.f32 %v1656_v28, %v1035_v13  ;;  %v1184_v33 = vpop.f32.mrb[33].mxu0  ;;  %v1216_v0 = vpop.f32.mrb[33].mxu1 }
 0x337   :  { %v1185_v34 = vadd.f32 %v1184_v33, %v1025_v11  ;;  %v1657_v60 = vpop.f32.mrb[34].mxu0  ;;  %v1665_v35 = vpop.f32.mrb[34].mxu1  ;;  %v1217_v44 = vadd.f32 %v1216_v0, %v1065_v22 }
 0x338   :  { %v1249_v25 = vmul.f32 0.2, %v1193_v32  ;;  %v1196_v37 = vadd.f32 %v1657_v60, %v1040_v14  ;;  %v1187_v38 = vpop.f32.mrb[35].mxu0  ;;  %v1219_v31 = vpop.f32.mrb[35].mxu1 }
 0x339   :  { %v1247_v1 = vmul.f32 0.2, %v1185_v34  ;;  %v1188_v61 = vadd.f32 %v1187_v38, %v1030_v12  ;;  %v1220_v11 = vadd.f32 %v1219_v31, %v1070_v24  ;;  %v1095_v60 = vpop.permute.xlu1 %1094 }
 0x33a   :  { %v1250_v40 = vmul.f32 0.2, %v1196_v37  ;;  %v1265_v46 = vmax.f32 %v1193_v32, %v1249_v25  ;;  %v1228_v32 = vadd.f32 %v1665_v35, %v1080_v27 }
 0x33b   :  { %v1263_v41 = vmax.f32 %v1185_v34, %v1247_v1  ;;  %v1248_v42 = vmul.f32 0.2, %v1188_v61  ;;  %v1256_v33 = vmul.f32 0.2, %v1220_v11 }
 0x33c   :  { %v1266_v58 = vmax.f32 %v1196_v37, %v1250_v40  ;;  %v1377_v39 = vmul.f32 %v1308_v6, %v1265_v46 }
 0x33d   :  { %v1264_v51 = vmax.f32 %v1188_v61, %v1248_v42  ;;  %v1660_v54 = vpop.f32.mrb[36].mxu0  ;;  %v1668_v50 = vpop.f32.mrb[36].mxu1  ;;  %v1375_v4 = vmul.f32 %v1298_v16, %v1263_v41 }
 0x33e   :  { %v1209_v15 = vadd.f32 %v1660_v54, %v1055_v18  ;;  %v1200_v59 = vpop.f32.mrb[37].mxu0  ;;  %v1232_v48 = vpop.f32.mrb[37].mxu1  ;;  %v1378_v2 = vmul.f32 %v1313_v20, %v1266_v58  ;;  %v1241_v40 = vadd.f32 %v1668_v50, %v1095_v60 }
 0x33f   :  { %v1376_v19 = vmul.f32 %v1303_v62, %v1264_v51  ;;  %v1201_v55 = vadd.f32 %v1200_v59, %v1045_v45  ;;  %v1661_v17 = vpop.f32.mrb[38].mxu0  ;;  %v1669_v23 = vpop.f32.mrb[38].mxu1  ;;  %v1225_v62 = vadd.f32 %v1664_v29, %v1075_v63  ;;  %v1255_v45 = vmul.f32 0.2, %v1217_v44 }
 0x340   :  { %v1212_v47 = vadd.f32 %v1661_v17, %v1060_v52  ;;  %v1203_v5 = vpop.f32.mrb[39].mxu0  ;;  %v1235_v7 = vpop.f32.mrb[39].mxu1  ;;  %v1253_v43 = vmul.f32 0.2, %v1209_v15  ;;  %v1233_v37 = vadd.f32 %v1232_v48, %v1085_v3  ;;  %v1258_v63 = vmul.f32 0.2, %v1228_v32 }
 0x341   :  { %v1391_v8 = vadd.f32 %v1376_v19, %v1375_v4  ;;  %v1251_v9 = vmul.f32 0.2, %v1201_v55  ;;  %v1204_v10 = vadd.f32 %v1203_v5, %v1050_v56  ;;  %v1348_v52 = vpop.permute.xlu0 %1347  ;;  %v1257_v20 = vmul.f32 0.2, %v1225_v62  ;;  %v1100_v42 = vpop.permute.xlu1 %1099 }
 0x342   :  { %v1254_v14 = vmul.f32 0.2, %v1212_v47  ;;  %v1269_v18 = vmax.f32 %v1209_v15, %v1253_v43  ;;  %v1271_v24 = vmax.f32 %v1217_v44, %v1255_v45  ;;  %v1272_v29 = vmax.f32 %v1220_v11, %v1256_v33 }
 0x343   :  { %v1392_v12 = vadd.f32 %v1391_v8, %v1377_v39  ;;  %v1267_v13 = vmax.f32 %v1201_v55, %v1251_v9  ;;  %v1252_v16 = vmul.f32 0.2, %v1204_v10  ;;  %v1236_v1 = vadd.f32 %v1235_v7, %v1090_v49 }
 0x344   :  { %v1270_v34 = vmax.f32 %v1212_v47, %v1254_v14  ;;  %v1381_v25 = vmul.f32 %v2283_v53, %v1269_v18  ;;  %v1273_v27 = vmax.f32 %v1225_v62, %v1257_v20  ;;  %v1383_v35 = vmul.f32 %v2287_v30, %v1271_v24 }
 0x345   :  { %v1379_v28 = vmul.f32 %v1318_v21, %v1267_v13  ;;  %v1393_v6 = vadd.f32 %v1392_v12, %v1378_v2  ;;  %v1268_v22 = vmax.f32 %v1204_v10, %v1252_v16  ;;  %v1353_v61 = vpop.permute.xlu0 %1352  ;;  %v1259_v41 = vmul.f32 0.2, %v1233_v37  ;;  %v1363_v39 = vpop.permute.xlu1 %1362 }
 0x346   :  { %v1382_v21 = vmul.f32 %v2285_v26, %v1270_v34  ;;  %v1274_v46 = vmax.f32 %v1228_v32, %v1258_v63  ;;  %v1384_v51 = vmul.f32 %v1343_v36, %v1272_v29  ;;  %v1244_v54 = vadd.f32 %v1669_v23, %v1100_v42 }
 0x347   :  { %v1394_v0 = vadd.f32 %v1393_v6, %v1379_v28  ;;  %v1380_v56 = vmul.f32 %v2281_v57, %v1268_v22  ;;  %v1260_v3 = vmul.f32 0.2, %v1236_v1  ;;  %v1385_v58 = vmul.f32 %v1348_v52, %v1273_v27 }
 0x348   :  { %v1261_v15 = vmul.f32 0.2, %v1241_v40  ;;  %v1275_v59 = vmax.f32 %v1233_v37, %v1259_v41  ;;  %v1386_v4 = vmul.f32 %v1353_v61, %v1274_v46  ;;  %v1262_v19 = vmul.f32 0.2, %v1244_v54 }
 0x349   :  { %v1395_v38 = vadd.f32 %v1394_v0, %v1380_v56  ;;  %v1358_v26 = vpop.permute.xlu0 %1357  ;;  %v1276_v55 = vmax.f32 %v1236_v1, %v1260_v3  ;;  %v1373_v43 = vpop.permute.xlu1 %1372  ;;  %v1418_v49 = vlaneseq }
 0x34a   :  { %v1277_v30 = vmax.f32 %v1241_v40, %v1261_v15  ;;  %v1387_v50 = vmul.f32 %v1358_v26, %v1275_v59  ;;  %v1278_v47 = vmax.f32 %v1244_v54, %v1262_v19 }
 0x34b   :  { %v1396_v31 = vadd.f32 %v1395_v38, %v1381_v25  ;;  %v1388_v5 = vmul.f32 %v1363_v39, %v1276_v55  ;;  %v1419_v12 = vshrl.u32 %v1418_v49, 7 }
 0x34c   :  { %v1390_v9 = vmul.f32 %v1373_v43, %v1278_v47 }
 0x34d   :  { %v1397_v57 = vadd.f32 %v1396_v31, %v1382_v21  ;;  %v1368_v36 = vpop.permute.xlu0 %1367  ;;  %v1420_v16 = vsub.s32 0, %v1419_v12 }
 0x34e   :  { %v1389_v23 = vmul.f32 %v1368_v36, %v1277_v30 }
 0x34f   :  { %v1398_v53 = vadd.f32 %v1397_v57, %v1383_v35 }
 0x351   :  { %v1399_v48 = vadd.f32 %v1398_v53, %v1384_v51  ;;  %v1416_v45 = vpop.permute.xlu0 %1415 }
 0x352   :  { %v1421_v28 = vrot.slane %v1416_v45, %v1420_v16 }
 0x353   :  { %v1400_v17 = vadd.f32 %v1399_v48, %v1385_v58 }
 0x355   :  { %v1401_v44 = vadd.f32 %v1400_v17, %v1386_v4 }
 0x357   :  { %v1402_v7 = vadd.f32 %v1401_v44, %v1387_v50 }
 0x359   :  { %v1403_v8 = vadd.f32 %v1402_v7, %v1388_v5 }
 0x35b   :  { %v1404_v10 = vadd.f32 %v1403_v8, %v1389_v23 }
 0x35d   :  { %v1405_v2 = vadd.f32 %v1404_v10, %v1390_v9 }
 0x35f   :  { %v1406_v11 = vrot.slane %v1405_v2, 4 }
 0x361   :  { %v1407_v13 = vadd.f32 %v1406_v11, %v1405_v2 }
 0x363   :  { %v1408_v14 = vrot.slane %v1407_v13, 2 }
 0x365   :  { %v1409_v62 = vadd.f32 %v1408_v14, %v1407_v13 }
 0x367   :  { %v1410_v18 = vrot.slane %v1409_v62, 1 }
 0x369   :  { %v1411_v6 = vadd.f32 %v1410_v18, %v1409_v62 }
 0x36b   :  { %v1422_v22 = vadd.f32 %v1421_v28, %v1411_v6 }
 0x36d   :  { %1423 = vst [vmem:[#allocation3] sm:$0xff] %v1422_v22 }
 0x36e   :  { %1757 = shalt.err (!%p1754_p4)
}
 0x36f   :  { %s1758_s21 = scalar_lea.hbm %s2314_s9, 128 }
 0x370   :  { %p1759_p5 = scmp.ne.s32.totalorder %s2314_s9, %s1758_s21  ;;  %p1762_p6 = scmp.lt.u32.totalorder %s1758_s21, %s2314_s9 }
 0x372   :  { %p1764_p7 = pnand %p1762_p6, %p1759_p5 }
 0x374   :  { %1767 = shalt.err (!%p1764_p7)
}
 0x375   :  { %1433 = dma.vmem_to_hbm [thread:$0]  %s1431_s0, 128, %s2314_s9, [#allocation4]  }
 0x376   :  { %1768 = dma.done.wait [#allocation4], 128  }
 0x377   :  { %1769 = vsyncadd [#allocation4], 4294967168 }
 0x378   :  { %1437 = vsyncpa [#allocation4], 1 }

</bundles_post_ra>
